<compile_context>
chip_gen: v6e
topology: v6e:2x2x1
jax: 0.10.0
libtpu: 0.0.40
codegen_flags: <defaults>
</compile_context>

<pallas_src>
import functools
import inspect

import jax
import jax.numpy as jnp
from jax.experimental import pallas as pl
from jax.experimental.pallas import tpu as pltpu

LATENT_DIM = 2
FUSED_OUT = 128              # lane-dense fused [mu | logvar | zeros] width
MU_OFF = 0                   # mu   -> cols [0:2]
LV_OFF = LATENT_DIM          # logvar -> cols [2:4]

_HAS_PIPELINE_MODE = (
    "pipeline_mode" in inspect.signature(pl.BlockSpec).parameters
    and hasattr(pl, "Buffered")
)


def _encoder_kernel(x_ref, w1_ref, b1_ref, w2_ref, b2_ref, w3_ref, b3_ref,
                    out_ref):
    x = x_ref[...]                                             # (TILE_B, 784)

    # fc1 + relu: bf16 MXU matmul, f32 accumulation / bias / relu.
    h1 = jnp.dot(x.astype(jnp.bfloat16), w1_ref[...],
                 preferred_element_type=jnp.float32) + b1_ref[...]
    h1 = jnp.maximum(h1, 0.0).astype(jnp.bfloat16)             # (TILE_B, 512)

    # fc2 + relu
    h2 = jnp.dot(h1, w2_ref[...],
                 preferred_element_type=jnp.float32) + b2_ref[...]
    h2 = jnp.maximum(h2, 0.0).astype(jnp.bfloat16)             # (TILE_B, 256)

    # fused fc31/fc32: one 128-wide matmul -> [mu | logvar | zeros]
    out_ref[...] = jnp.dot(h2, w3_ref[...],
                           preferred_element_type=jnp.float32) + b3_ref[...]


def init_params(key):
    """PyTorch-style U(-1/sqrt(fan_in), +1/sqrt(fan_in)) init.

    Weights stored as (in_features, out_features)."""
    dims = {
        "fc1": (784, 512), "fc2": (512, 256),
        "fc31": (256, LATENT_DIM), "fc32": (256, LATENT_DIM),
    }
    params = {}
    for name, (fan_in, fan_out) in dims.items():
        key, kw, kb = jax.random.split(key, 3)
        bound = 1.0 / jnp.sqrt(float(fan_in))
        params[name + "_w"] = jax.random.uniform(
            kw, (fan_in, fan_out), jnp.float32, -bound, bound)
        params[name + "_b"] = jax.random.uniform(
            kb, (1, fan_out), jnp.float32, -bound, bound)
    return params


def prepare_params(params):
    """One-time preprocessing into kernel-ready arrays.

    Returns (w1, b1, w2, b2, w3, b3): weights bf16, biases f32, fc31/fc32
    fused into one zero-padded (256, 128) weight / (1, 128) bias.
    Call once at init/load time, NOT per forward."""
    w1 = params["fc1_w"].astype(jnp.bfloat16)
    b1 = params["fc1_b"].astype(jnp.float32)
    w2 = params["fc2_w"].astype(jnp.bfloat16)
    b2 = params["fc2_b"].astype(jnp.float32)

    w3 = jnp.zeros((256, FUSED_OUT), jnp.float32)
    w3 = w3.at[:, MU_OFF:MU_OFF + LATENT_DIM].set(params["fc31_w"])
    w3 = w3.at[:, LV_OFF:LV_OFF + LATENT_DIM].set(params["fc32_w"])
    b3 = jnp.zeros((1, FUSED_OUT), jnp.float32)
    b3 = b3.at[:, MU_OFF:MU_OFF + LATENT_DIM].set(params["fc31_b"])
    b3 = b3.at[:, LV_OFF:LV_OFF + LATENT_DIM].set(params["fc32_b"])
    return (w1, b1, w2, b2, w3.astype(jnp.bfloat16), b3)


def _round_up(v, m):
    return ((v + m - 1) // m) * m


def _const_spec(shape):
    """VMEM-resident (constant index_map) weight/bias spec, single-buffered."""
    if _HAS_PIPELINE_MODE:
        return pl.BlockSpec(shape, lambda i: (0, 0),
                            pipeline_mode=pl.Buffered(1))
    return pl.BlockSpec(shape, lambda i: (0, 0))


@functools.partial(jax.jit, static_argnames=("tile_b",))
def encoder_mlp2_forward(x_nchw, w1, b1, w2, b2, w3, b3, *, tile_b=512):
    """x_nchw: (B, 1, 28, 28) or (B, 784), f32 (or bf16) -> (mu, logvar), (B, 2).

    tile_b is an upper bound on the batch tile; the actual tile is chosen so
    the grid has >= 2 "parallel" steps (megacore on v7x) when B allows.
    tile_b=512 (default) needs ~5 MiB VMEM; even 1024 stays under 32 MiB."""
    B = x_nchw.shape[0]
    x = x_nchw.reshape(B, 784)
    if x.dtype not in (jnp.bfloat16, jnp.float32):
        x = x.astype(jnp.float32)

    # Keep >= 2 grid steps when possible, tile a multiple of 8, capped at tile_b.
    tile = min(tile_b, _round_up(pl.cdiv(B, 2), 8))
    tile = max(8, _round_up(tile, 8))
    grid = (pl.cdiv(B, tile),)

    # Bytes: bf16 weights + f32 biases read once; x / fused output streamed.
    weight_bytes = (784 * 512 + 512 * 256 + 256 * FUSED_OUT) * 2 \
        + (512 + 256 + FUSED_OUT) * 4
    x_bytes = B * 784 * jnp.dtype(x.dtype).itemsize
    cost = pl.CostEstimate(
        flops=2 * B * (784 * 512 + 512 * 256 + 256 * FUSED_OUT),
        transcendentals=0,
        bytes_accessed=int(weight_bytes + x_bytes + B * FUSED_OUT * 4),
    )

    out = pl.pallas_call(
        _encoder_kernel,
        out_shape=jax.ShapeDtypeStruct((B, FUSED_OUT), jnp.float32),
        grid=grid,
        in_specs=[
            pl.BlockSpec((tile, 784), lambda i: (i, 0)),          # x (streamed)
            _const_spec((784, 512)), _const_spec((1, 512)),       # fc1
            _const_spec((512, 256)), _const_spec((1, 256)),       # fc2
            _const_spec((256, FUSED_OUT)), _const_spec((1, FUSED_OUT)),  # fused fc3
        ],
        out_specs=pl.BlockSpec((tile, FUSED_OUT), lambda i: (i, 0)),
        compiler_params=pltpu.CompilerParams(
            dimension_semantics=("parallel",),
            vmem_limit_bytes=32 << 20,
        ),
        cost_estimate=cost,
    )(x, w1, b1, w2, b2, w3, b3)

    mu = out[:, MU_OFF:MU_OFF + LATENT_DIM]
    logvar = out[:, LV_OFF:LV_OFF + LATENT_DIM]
    return mu, logvar


def _reference_forward(x_nchw, params):
    """Pure-JAX reference using the same bf16-weight / bf16-activation matmul
    quantization the kernel uses (f32 accumulation), for a tight check."""
    B = x_nchw.shape[0]
    x = x_nchw.reshape(B, 784).astype(jnp.float32)

    def qdot(a, w):
        return jnp.dot(a.astype(jnp.bfloat16), w.astype(jnp.bfloat16),
                       preferred_element_type=jnp.float32)

    h = jax.nn.relu(qdot(x, params["fc1_w"]) + params["fc1_b"])
    h = jax.nn.relu(qdot(h, params["fc2_w"]) + params["fc2_b"])
    mu = qdot(h, params["fc31_w"]) + params["fc31_b"]
    logvar = qdot(h, params["fc32_w"]) + params["fc32_b"]
    return mu, logvar


if __name__ == "__main__":
    key = jax.random.PRNGKey(0)
    k_param, k_x = jax.random.split(key)

    params = init_params(k_param)
    kparams = prepare_params(params)          # one-time, outside the forward

    B = 16
    x = jax.random.normal(k_x, (B, 1, 28, 28), dtype=jnp.float32)

    mu, logvar = encoder_mlp2_forward(x, *kparams)
    jax.block_until_ready((mu, logvar))

    mu_ref, logvar_ref = _reference_forward(x, params)
    assert mu.shape == (B, LATENT_DIM) and logvar.shape == (B, LATENT_DIM)
    assert jnp.allclose(mu, mu_ref, atol=1e-4, rtol=1e-4)
    assert jnp.allclose(logvar, logvar_ref, atol=1e-4, rtol=1e-4)

    # Non-multiple batch exercises the pad-free partial-block path.
    B2 = 13
    mu2, logvar2 = encoder_mlp2_forward(x[:B2], *kparams)
    jax.block_until_ready((mu2, logvar2))
    assert mu2.shape == (B2, LATENT_DIM) and logvar2.shape == (B2, LATENT_DIM)
    assert jnp.allclose(mu2, mu_ref[:B2], atol=1e-4, rtol=1e-4)
    assert jnp.allclose(logvar2, logvar_ref[:B2], atol=1e-4, rtol=1e-4)

    print("KERNEL_OK")
</pallas_src>

<mosaic_0001>
module attributes {stable_mosaic.version = 11 : i64} {
  func.func @_encoder_kernel(%arg0: i32, %arg1: memref<8x784xf32, #tpu.memory_space<vmem>>, %arg2: memref<784x512xbf16, #tpu.memory_space<vmem>>, %arg3: memref<1x512xf32, #tpu.memory_space<vmem>>, %arg4: memref<512x256xbf16, #tpu.memory_space<vmem>>, %arg5: memref<1x256xf32, #tpu.memory_space<vmem>>, %arg6: memref<256x128xbf16, #tpu.memory_space<vmem>>, %arg7: memref<1x128xf32, #tpu.memory_space<vmem>>, %arg8: memref<8x128xf32, #tpu.memory_space<vmem>>) attributes {dimension_semantics = [#tpu.dimension_semantics<parallel>], iteration_bounds = array<i64: 2>, scalar_prefetch = 0 : i64, scratch_operands = 0 : i64, tpu.core_type = #tpu.core_type<tc>, window_params = [{transform_indices = @transform_0, window_bounds = array<i64: 8, 784>}, {pipeline_mode = #tpu.pipeline_mode<synchronous>, transform_indices = @transform_1, window_bounds = array<i64: 784, 512>}, {pipeline_mode = #tpu.pipeline_mode<synchronous>, transform_indices = @transform_2, window_bounds = array<i64: 1, 512>}, {pipeline_mode = #tpu.pipeline_mode<synchronous>, transform_indices = @transform_3, window_bounds = array<i64: 512, 256>}, {pipeline_mode = #tpu.pipeline_mode<synchronous>, transform_indices = @transform_4, window_bounds = array<i64: 1, 256>}, {pipeline_mode = #tpu.pipeline_mode<synchronous>, transform_indices = @transform_5, window_bounds = array<i64: 256, 128>}, {pipeline_mode = #tpu.pipeline_mode<synchronous>, transform_indices = @transform_6, window_bounds = array<i64: 1, 128>}, {transform_indices = @transform_7, window_bounds = array<i64: 8, 128>}]} {
    %c0 = arith.constant 0 : index
    %c0_0 = arith.constant 0 : index
    %0 = vector.load %arg1[%c0, %c0_0] : memref<8x784xf32, #tpu.memory_space<vmem>>, vector<8x784xf32>
    %1 = arith.truncf %0 : vector<8x784xf32> to vector<8x784xbf16>
    %c0_1 = arith.constant 0 : index
    %c0_2 = arith.constant 0 : index
    %2 = vector.load %arg2[%c0_1, %c0_2] : memref<784x512xbf16, #tpu.memory_space<vmem>>, vector<784x512xbf16>
    %cst = arith.constant dense<0.000000e+00> : vector<8x512xf32>
    %3 = tpu.matmul %1, %2, %cst {dimension_numbers = #tpu.dot_dimension_numbers<[1], [0], [0], [1], [0, 0, 1, 1], [], []>} : vector<8x784xbf16>, vector<784x512xbf16>, vector<8x512xf32> -> vector<8x512xf32>
    %c0_3 = arith.constant 0 : index
    %c0_4 = arith.constant 0 : index
    %4 = vector.load %arg3[%c0_3, %c0_4] : memref<1x512xf32, #tpu.memory_space<vmem>>, vector<1x512xf32>
    %5 = vector.broadcast %4 : vector<1x512xf32> to vector<8x512xf32>
    %6 = arith.addf %3, %5 : vector<8x512xf32>
    %cst_5 = arith.constant 0.000000e+00 : f32
    %7 = vector.broadcast %cst_5 : f32 to vector<8x512xf32>
    %8 = arith.maximumf %6, %7 : vector<8x512xf32>
    %9 = arith.truncf %8 : vector<8x512xf32> to vector<8x512xbf16>
    %c0_6 = arith.constant 0 : index
    %c0_7 = arith.constant 0 : index
    %10 = vector.load %arg4[%c0_6, %c0_7] : memref<512x256xbf16, #tpu.memory_space<vmem>>, vector<512x256xbf16>
    %cst_8 = arith.constant dense<0.000000e+00> : vector<8x256xf32>
    %11 = tpu.matmul %9, %10, %cst_8 {dimension_numbers = #tpu.dot_dimension_numbers<[1], [0], [0], [1], [0, 0, 1, 1], [], []>} : vector<8x512xbf16>, vector<512x256xbf16>, vector<8x256xf32> -> vector<8x256xf32>
    %c0_9 = arith.constant 0 : index
    %c0_10 = arith.constant 0 : index
    %12 = vector.load %arg5[%c0_9, %c0_10] : memref<1x256xf32, #tpu.memory_space<vmem>>, vector<1x256xf32>
    %13 = vector.broadcast %12 : vector<1x256xf32> to vector<8x256xf32>
    %14 = arith.addf %11, %13 : vector<8x256xf32>
    %cst_11 = arith.constant 0.000000e+00 : f32
    %15 = vector.broadcast %cst_11 : f32 to vector<8x256xf32>
    %16 = arith.maximumf %14, %15 : vector<8x256xf32>
    %17 = arith.truncf %16 : vector<8x256xf32> to vector<8x256xbf16>
    %c0_12 = arith.constant 0 : index
    %c0_13 = arith.constant 0 : index
    %18 = vector.load %arg6[%c0_12, %c0_13] : memref<256x128xbf16, #tpu.memory_space<vmem>>, vector<256x128xbf16>
    %cst_14 = arith.constant dense<0.000000e+00> : vector<8x128xf32>
    %19 = tpu.matmul %17, %18, %cst_14 {dimension_numbers = #tpu.dot_dimension_numbers<[1], [0], [0], [1], [0, 0, 1, 1], [], []>} : vector<8x256xbf16>, vector<256x128xbf16>, vector<8x128xf32> -> vector<8x128xf32>
    %c0_15 = arith.constant 0 : index
    %c0_16 = arith.constant 0 : index
    %20 = vector.load %arg7[%c0_15, %c0_16] : memref<1x128xf32, #tpu.memory_space<vmem>>, vector<1x128xf32>
    %21 = vector.broadcast %20 : vector<1x128xf32> to vector<8x128xf32>
    %22 = arith.addf %19, %21 : vector<8x128xf32>
    %c0_17 = arith.constant 0 : index
    %c0_18 = arith.constant 0 : index
    %23 = vector.load %arg8[%c0_17, %c0_18] : memref<8x128xf32, #tpu.memory_space<vmem>>, vector<8x128xf32>
    tpu.vector_store %arg8[%c0_17, %c0_18], %22 {strides = array<i32>} : memref<8x128xf32, #tpu.memory_space<vmem>>, vector<8x128xf32>,
    return
  }
  func.func @transform_0(%arg0: i32) -> (i32, i32) {
    %c0_i32 = arith.constant 0 : i32
    %c0_i32_0 = arith.constant 0 : i32
    return %arg0, %c0_i32 : i32, i32
  }
  func.func @transform_1(%arg0: i32) -> (i32, i32) {
    %c0_i32 = arith.constant 0 : i32
    %c0_i32_0 = arith.constant 0 : i32
    %c0_i32_1 = arith.constant 0 : i32
    return %c0_i32, %c0_i32_0 : i32, i32
  }
  func.func @transform_2(%arg0: i32) -> (i32, i32) {
    %c0_i32 = arith.constant 0 : i32
    %c0_i32_0 = arith.constant 0 : i32
    %c0_i32_1 = arith.constant 0 : i32
    return %c0_i32, %c0_i32_0 : i32, i32
  }
  func.func @transform_3(%arg0: i32) -> (i32, i32) {
    %c0_i32 = arith.constant 0 : i32
    %c0_i32_0 = arith.constant 0 : i32
    %c0_i32_1 = arith.constant 0 : i32
    return %c0_i32, %c0_i32_0 : i32, i32
  }
  func.func @transform_4(%arg0: i32) -> (i32, i32) {
    %c0_i32 = arith.constant 0 : i32
    %c0_i32_0 = arith.constant 0 : i32
    %c0_i32_1 = arith.constant 0 : i32
    return %c0_i32, %c0_i32_0 : i32, i32
  }
  func.func @transform_5(%arg0: i32) -> (i32, i32) {
    %c0_i32 = arith.constant 0 : i32
    %c0_i32_0 = arith.constant 0 : i32
    %c0_i32_1 = arith.constant 0 : i32
    return %c0_i32, %c0_i32_0 : i32, i32
  }
  func.func @transform_6(%arg0: i32) -> (i32, i32) {
    %c0_i32 = arith.constant 0 : i32
    %c0_i32_0 = arith.constant 0 : i32
    %c0_i32_1 = arith.constant 0 : i32
    return %c0_i32, %c0_i32_0 : i32, i32
  }
  func.func @transform_7(%arg0: i32) -> (i32, i32) {
    %c0_i32 = arith.constant 0 : i32
    %c0_i32_0 = arith.constant 0 : i32
    return %arg0, %c0_i32 : i32, i32
  }
}

</mosaic_0001>

<bundles_post_ra>
// kernel: encoder_mlp2_forward.1
= control target key start
LH: loop header
LB: loop body
LE: loop exit
PB: predicated region body
PF: predicated region fallthrough
CT: control target
= control target key end

     0   :  { %12 = vsyncpa [#allocation3], 0  ;;  %s4181_s0 = inlined_call_operand.vmem [shape: f32[16,784], index: 0, kind: input, shape index: {}]   ;;  %s4182_s1 = inlined_call_operand.vmem [shape: bf16[784,512], index: 1, kind: input, shape index: {}]   ;;  %s4183_s2 = inlined_call_operand.vmem [shape: f32[1,512], index: 2, kind: input, shape index: {}]   ;;  %s4184_s3 = inlined_call_operand.hbm [shape: bf16[512,256], index: 3, kind: input, shape index: {}]   ;;  %s4185_s4 = inlined_call_operand.vmem [shape: f32[1,256], index: 4, kind: input, shape index: {}]   ;;  %s4186_s5 = inlined_call_operand.hbm [shape: bf16[256,128], index: 5, kind: input, shape index: {}]   ;;  %s4187_s6 = inlined_call_operand.vmem [shape: f32[1,128], index: 6, kind: input, shape index: {}]   ;;  %s4188_s7 = inlined_call_operand.vmem [shape: f32[16,128], index: 7, kind: output, shape index: {}]  }
   0x1   :  { %13 = vsyncpa [#allocation5], 0  ;;  %s3463_s24 = smov 0  }
   0x2 LB: > { %s3416_s25 = smov [#allocation2]   ;;  %s3469_s27 = sadd.s32 4294967295, %s3414_s24   ;;  %s3414_s24 = sphi %s3463_s24, %s19_s24  }
   0x3   : > { %s220_s26 = sshll.u32 %s3416_s25, 4  ;;  %p2595_p0 = scmp.ge.s32.totalorder %s3414_s24, 1  ;;  %s221_s26 = int_to_ptr.vmem [resolvable:$true] %s220_s26 }
   0x4   : > { %p202_p1 = scmp.lt.s32.totalorder %s3414_s24, 3  ;;  %p2923_p3 = scmp.eq.s32.totalorder %s3469_s27, 0 }
   0x5   : > { %s3417_s29 = smov [#allocation4]   ;;  %s3359_s9 = scalar_lea.vmem %s221_s26, 8192 }
   0x6   : > { %p3473_p2 = pnand %p2595_p0, %p202_p1  ;;  %s236_s30 = sshll.u32 %s3417_s29, 4  ;;  %s237_s30 = int_to_ptr.vmem [resolvable:$true] %s236_s30 }
   0x7   : > { %p3360_p7 = scmp.ne.s32.totalorder %s221_s26, %s3359_s9  ;;  %p3367_p10 = scmp.lt.s32.totalorder %s221_s26, %s221_s26 }
   0x8   : > { %p2916_p4 = pneg %p3473_p2  ;;  %p3368_p11 = scmp.lt.s32.totalorder %s3359_s9, %s3359_s9 }
   0xa   : > { %p3482_p5 = pnand %p2923_p3, %p2916_p4  ;;  %p3369_p12 = por %p3368_p11, %p3367_p10 }
   0xc   : > { %p3350_p6 = pneg %p3482_p5 }
   0xe   : > { %p3362_p8 = pnand %p3360_p7, %p3350_p6 }
  0x10   : > { %p3363_p9 = pneg %p3362_p8 }
  0x12   : > { %p3370_p13 = pnand %p3369_p12, %p3363_p9 }
  0x14   : > { %3373 = shalt.err (!%p3370_p13)
}
  0x15   : > { %s3418_s10 = smov 128   ;;  %s3419_s11 = smov 8  }
  0x16   : > { %2919 = dma.hbm_to_vmem [thread:$0]  (!%p3482_p5), %s4184_s3, 8192, %s221_s26, [#allocation3], %s3418_s10, %s3418_s10, %s3419_s11  }
  0x17   : > { %s3385_s14 = scalar_lea.vmem %s237_s30, 2048  ;;  %p3393_p7 = scmp.lt.s32.totalorder %s237_s30, %s237_s30 }
  0x18   : > { %p3386_p0 = scmp.ne.s32.totalorder %s237_s30, %s3385_s14  ;;  %p3394_p8 = scmp.lt.s32.totalorder %s3385_s14, %s3385_s14 }
  0x1a   : > { %p3388_p1 = pnand %p3386_p0, %p3350_p6  ;;  %p3395_p10 = por %p3394_p8, %p3393_p7 }
  0x1c   : > { %p3389_p4 = pneg %p3388_p1 }
  0x1e   : > { %p3396_p9 = pnand %p3395_p10, %p3389_p4 }
  0x20   : > { %3399 = shalt.err (!%p3396_p9)
}
  0x21   : > { %s3420_s15 = smov 64   ;;  %s3421_s16 = smov 4  }
  0x22   : > { %2922 = dma.hbm_to_vmem [thread:$0]  (!%p3482_p5), %s4186_s5, 2048, %s237_s30, [#allocation5], %s3420_s15, %s3420_s15, %s3421_s16  }
  0x23   : > { %263 = sbr.rel (%p3473_p2) target bundleno = 857 (0x359), region = 48 }
  0x28   : > { %3405 = dma.done.wait (%p2923_p3), [#allocation3], 8192  }
  0x29   : > { %3407 = vsyncadd (%p2923_p3), [#allocation3], 4294959104 }
  0x2a   : > { %3409 = dma.done.wait (%p2923_p3), [#allocation5], 2048  }
  0x2b   : > { %3411 = vsyncadd (%p2923_p3), [#allocation5], 4294965248  ;;  %v2942_v0 = vld [vmem:[%s4182_s1 + $0xe4] ss:$16 sps:$4 sm:$0xff]   ;;  %v2946_v2 = vld [vmem:[%s4182_s1 + $0xe0] ss:$16 sps:$4 sm:$0xff]  }
  0x2c   : > { %v2944_v1 = vld [vmem:[%s4182_s1 + $0x2e4] ss:$16 sps:$4 sm:$0xff]   ;;  %1524 = vmatprep.subr.bf16.mxu0 %v2942_v0  ;;  %v2947_v3 = vld [vmem:[%s4182_s1 + $0x2e0] ss:$16 sps:$4 sm:$0xff]   ;;  %p298_p2 = scmp.lt.s32.totalorder %s3469_s27, 1  ;;  %vm1520_vm0 = vcmask 130048  }
  0x2d   : > { %1565 = vmatprep.subr.bf16.mxu1 %v2944_v1  ;;  %v2948_v4 = vld [vmem:[%s4182_s1 + $0xc4] ss:$16 sps:$4 sm:$0xff]   ;;  %1525 = vmatpush1.bf16.msra.mxu0 %v2946_v2  ;;  %v2952_v6 = vld [vmem:[%s4182_s1 + $0xc0] ss:$16 sps:$4 sm:$0xff]  }
  0x2e   : > { %1566 = vmatpush1.bf16.msra.mxu1 %v2947_v3  ;;  %v2950_v5 = vld [vmem:[%s4182_s1 + $0x2c4] ss:$16 sps:$4 sm:$0xff]   ;;  %1526 = vmatprep.subr.bf16.mxu0 %v2948_v4  ;;  %v2953_v7 = vld [vmem:[%s4182_s1 + $0x2c0] ss:$16 sps:$4 sm:$0xff]   ;;  %s4192_s27 = smov (!%p298_p2, %s3469_s27), 1 }
  0x2f   : > { %1567 = vmatprep.subr.bf16.mxu1 %v2950_v5  ;;  %v2954_v8 = vld [vmem:[%s4182_s1 + $0xa4] ss:$16 sps:$4 sm:$0xff]   ;;  %v2958_v10 = vld [vmem:[%s4182_s1 + $0xa0] ss:$16 sps:$4 sm:$0xff]   ;;  %s2907_s13 = smul.u32 56, %s4192_s27  ;;  %s2603_s30 = sshll.u32 %s4192_s27, 3 }
  0x30   : > { %v2956_v9 = vld [vmem:[%s4182_s1 + $0x2a4] ss:$16 sps:$4 sm:$0xff]   ;;  %v2959_v11 = vld [vmem:[%s4182_s1 + $0x2a0] ss:$16 sps:$4 sm:$0xff]   ;;  %s306_s12 = scalar_lea.vmem %s4188_s7, %s2603_s30 }
  0x31   : > { %1527 = vmatpush1.bf16.msra.mxu0 %v2952_v6  ;;  %v2960_v12 = vld [vmem:[%s4182_s1 + $0x84] ss:$16 sps:$4 sm:$0xff]   ;;  %v2964_v14 = vld [vmem:[%s4182_s1 + $0x80] ss:$16 sps:$4 sm:$0xff]   ;;  %s3654_s28 = scalar_lea.vmem %s4181_s0, %s2907_s13 }
  0x32   : > { %1568 = vmatpush1.bf16.msra.mxu1 %v2953_v7  ;;  %1528 = vmatprep.subr.bf16.mxu0 %v2954_v8  ;;  %v2962_v13 = vld [vmem:[%s4182_s1 + $0x284] ss:$16 sps:$4 sm:$0xff]   ;;  %v2965_v15 = vld [vmem:[%s4182_s1 + $0x280] ss:$16 sps:$4 sm:$0xff]   ;;  %v309_v46 = vld [vmem:[%s3654_s28 + $0x8] sm:$0xff] }
  0x33   : > { %1569 = vmatprep.subr.bf16.mxu1 %v2956_v9  ;;  %v2966_v16 = vld [vmem:[%s4182_s1 + $0x64] ss:$16 sps:$4 sm:$0xff]   ;;  %v2970_v18 = vld [vmem:[%s4182_s1 + $0x60] ss:$16 sps:$4 sm:$0xff]   ;;  %v3669_v49 = vpack.c.bf16 %v309_v46, %v309_v46  ;;  %v311_v50 = vld [vmem:[%s3654_s28 + $0x18] sm:$0xff] }
  0x34   : > { %v2968_v17 = vld [vmem:[%s4182_s1 + $0x264] ss:$16 sps:$4 sm:$0xff]   ;;  %v2971_v19 = vld [vmem:[%s4182_s1 + $0x260] ss:$16 sps:$4 sm:$0xff]   ;;  %v3675_v52 = vpack.c.bf16 %v311_v50, %v311_v50 }
  0x35   : > { %1529 = vmatpush1.bf16.msra.mxu0 %v2958_v10  ;;  %v2972_v20 = vld [vmem:[%s4182_s1 + $0x44] ss:$16 sps:$4 sm:$0xff]   ;;  %v2976_v22 = vld [vmem:[%s4182_s1 + $0x40] ss:$16 sps:$4 sm:$0xff]   ;;  %1556 = vmatprep.mubr.bf16.mxu0 %v3669_v49 }
  0x36   : > { %1570 = vmatpush1.bf16.msra.mxu1 %v2959_v11  ;;  %1530 = vmatprep.subr.bf16.mxu0 %v2960_v12  ;;  %v2974_v21 = vld [vmem:[%s4182_s1 + $0x244] ss:$16 sps:$4 sm:$0xff]   ;;  %v2977_v23 = vld [vmem:[%s4182_s1 + $0x240] ss:$16 sps:$4 sm:$0xff]  }
  0x37   : > { %1571 = vmatprep.subr.bf16.mxu1 %v2962_v13  ;;  %v2978_v24 = vld [vmem:[%s4182_s1 + $0x24] ss:$16 sps:$4 sm:$0xff]   ;;  %v2982_v26 = vld [vmem:[%s4182_s1 + $0x20] ss:$16 sps:$4 sm:$0xff]   ;;  %1597 = vmatprep.mubr.bf16.mxu1 %v3675_v52  ;;  %v3049_v13 = vld [vmem:[%s4182_s1 + $0xec] ss:$16 sps:$4 sm:$0xff]  }
  0x38   : > { %v2980_v25 = vld [vmem:[%s4182_s1 + $0x224] ss:$16 sps:$4 sm:$0xff]   ;;  %v2983_v27 = vld [vmem:[%s4182_s1 + $0x220] ss:$16 sps:$4 sm:$0xff]  }
  0x39   : > { %1531 = vmatpush1.bf16.msra.mxu0 %v2964_v14  ;;  %v2984_v28 = vld [vmem:[%s4182_s1 + $0x4] ss:$16 sps:$4 sm:$0xff]   ;;  %v2988_v30 = vld [vmem:[%s4182_s1] ss:$16 sps:$4 sm:$0xff]  }
  0x3a   : > { %1572 = vmatpush1.bf16.msra.mxu1 %v2965_v15  ;;  %1532 = vmatprep.subr.bf16.mxu0 %v2966_v16  ;;  %v2986_v29 = vld [vmem:[%s4182_s1 + $0x204] ss:$16 sps:$4 sm:$0xff]   ;;  %v2989_v31 = vld [vmem:[%s4182_s1 + $0x200] ss:$16 sps:$4 sm:$0xff]   ;;  %v3422_v16 = vmov 0  }
  0x3b   : > { %1573 = vmatprep.subr.bf16.mxu1 %v2968_v17  ;;  %v2990_v32 = vld [vmem:[%s4182_s1 + $0x1e4] ss:$16 sps:$4 sm:$0xff]   ;;  %v2994_v34 = vld [vmem:[%s4182_s1 + $0x1e0] ss:$16 sps:$4 sm:$0xff]  }
  0x3c   : > { %v2992_v33 = vld [vmem:[%s4182_s1 + $0x3e4] ss:$16 sps:$4 sm:$0xff]   ;;  %v2995_v35 = vld [vmem:[%s4182_s1 + $0x3e0] ss:$16 sps:$4 sm:$0xff]  }
  0x3d   : > { %1533 = vmatpush1.bf16.msra.mxu0 %v2970_v18  ;;  %v2996_v36 = vld [vmem:[%s4182_s1 + $0x1c4] ss:$16 sps:$4 sm:$0xff]   ;;  %v3000_v38 = vld [vmem:[%s4182_s1 + $0x1c0] ss:$16 sps:$4 sm:$0xff]   ;;  %v3047_v18 = vld [vmem:[%s4182_s1 + $0xe8] ss:$16 sps:$4 sm:$0xff]  }
  0x3e   : > { %1574 = vmatpush1.bf16.msra.mxu1 %v2971_v19  ;;  %1534 = vmatprep.subr.bf16.mxu0 %v2972_v20  ;;  %v2998_v37 = vld [vmem:[%s4182_s1 + $0x3c4] ss:$16 sps:$4 sm:$0xff]   ;;  %v3001_v39 = vld [vmem:[%s4182_s1 + $0x3c0] ss:$16 sps:$4 sm:$0xff]  }
  0x3f   : > { %1575 = vmatprep.subr.bf16.mxu1 %v2974_v21  ;;  %v3002_v40 = vld [vmem:[%s4182_s1 + $0x1a4] ss:$16 sps:$4 sm:$0xff]   ;;  %v3006_v42 = vld [vmem:[%s4182_s1 + $0x1a0] ss:$16 sps:$4 sm:$0xff]   ;;  %v3055_v21 = vld [vmem:[%s4182_s1 + $0xcc] ss:$16 sps:$4 sm:$0xff]  }
  0x40   : > { %v3004_v41 = vld [vmem:[%s4182_s1 + $0x3a4] ss:$16 sps:$4 sm:$0xff]   ;;  %v3007_v43 = vld [vmem:[%s4182_s1 + $0x3a0] ss:$16 sps:$4 sm:$0xff]  }
  0x41   : > { %1535 = vmatpush1.bf16.msra.mxu0 %v2976_v22  ;;  %v3008_v44 = vld [vmem:[%s4182_s1 + $0x184] ss:$16 sps:$4 sm:$0xff]   ;;  %v3012_v47 = vld [vmem:[%s4182_s1 + $0x180] ss:$16 sps:$4 sm:$0xff]  }
  0x42   : > { %1576 = vmatpush1.bf16.msra.mxu1 %v2977_v23  ;;  %1536 = vmatprep.subr.bf16.mxu0 %v2978_v24  ;;  %v3010_v45 = vld [vmem:[%s4182_s1 + $0x384] ss:$16 sps:$4 sm:$0xff]   ;;  %v3013_v48 = vld [vmem:[%s4182_s1 + $0x380] ss:$16 sps:$4 sm:$0xff]   ;;  %v3053_v23 = vld [vmem:[%s4182_s1 + $0xc8] ss:$16 sps:$4 sm:$0xff]  }
  0x43   : > { %1577 = vmatprep.subr.bf16.mxu1 %v2980_v25  ;;  %v3014_v51 = vld [vmem:[%s4182_s1 + $0x164] ss:$16 sps:$4 sm:$0xff]   ;;  %v3018_v54 = vld [vmem:[%s4182_s1 + $0x160] ss:$16 sps:$4 sm:$0xff]   ;;  %v3061_v25 = vld [vmem:[%s4182_s1 + $0xac] ss:$16 sps:$4 sm:$0xff]  }
  0x44   : > { %v3016_v53 = vld [vmem:[%s4182_s1 + $0x364] ss:$16 sps:$4 sm:$0xff]   ;;  %v3019_v55 = vld [vmem:[%s4182_s1 + $0x360] ss:$16 sps:$4 sm:$0xff]  }
  0x45   : > { %1537 = vmatpush1.bf16.msra.mxu0 %v2982_v26  ;;  %v3020_v56 = vld [vmem:[%s4182_s1 + $0x144] ss:$16 sps:$4 sm:$0xff]   ;;  %v3024_v58 = vld [vmem:[%s4182_s1 + $0x140] ss:$16 sps:$4 sm:$0xff]  }
  0x46   : > { %1578 = vmatpush1.bf16.msra.mxu1 %v2983_v27  ;;  %1538 = vmatprep.subr.bf16.mxu0 %v2984_v28  ;;  %v3022_v57 = vld [vmem:[%s4182_s1 + $0x344] ss:$16 sps:$4 sm:$0xff]   ;;  %v3025_v59 = vld [vmem:[%s4182_s1 + $0x340] ss:$16 sps:$4 sm:$0xff]   ;;  %v3059_v27 = vld [vmem:[%s4182_s1 + $0xa8] ss:$16 sps:$4 sm:$0xff]  }
  0x47   : > { %1579 = vmatprep.subr.bf16.mxu1 %v2986_v29  ;;  %v3026_v60 = vld [vmem:[%s4182_s1 + $0x124] ss:$16 sps:$4 sm:$0xff]   ;;  %v3030_v62 = vld [vmem:[%s4182_s1 + $0x120] ss:$16 sps:$4 sm:$0xff]   ;;  %v3067_v29 = vld [vmem:[%s4182_s1 + $0x8c] ss:$16 sps:$4 sm:$0xff]  }
  0x48   : > { %v3028_v61 = vld [vmem:[%s4182_s1 + $0x324] ss:$16 sps:$4 sm:$0xff]   ;;  %v3031_v63 = vld [vmem:[%s4182_s1 + $0x320] ss:$16 sps:$4 sm:$0xff]  }
  0x49   : > { %1539 = vmatpush1.bf16.msra.mxu0 %v2988_v30  ;;  %v3032_v0 = vld [vmem:[%s4182_s1 + $0x104] ss:$16 sps:$4 sm:$0xff]   ;;  %v3036_v2 = vld [vmem:[%s4182_s1 + $0x100] ss:$16 sps:$4 sm:$0xff]  }
  0x4a   : > { %1580 = vmatpush1.bf16.msra.mxu1 %v2989_v31  ;;  %1540 = vmatprep.subr.bf16.mxu0 %v2990_v32  ;;  %v3034_v1 = vld [vmem:[%s4182_s1 + $0x304] ss:$16 sps:$4 sm:$0xff]   ;;  %v3037_v3 = vld [vmem:[%s4182_s1 + $0x300] ss:$16 sps:$4 sm:$0xff]   ;;  %v3065_v31 = vld [vmem:[%s4182_s1 + $0x88] ss:$16 sps:$4 sm:$0xff]  }
  0x4b   : > { %1581 = vmatprep.subr.bf16.mxu1 %v2992_v33  ;;  %v308_v4 = vld [vmem:[%s3654_s28] sm:$0xff]  ;;  %v310_v5 = vld [vmem:[%s3654_s28 + $0x10] sm:$0xff]  ;;  %v3073_v33 = vld [vmem:[%s4182_s1 + $0x6c] ss:$16 sps:$4 sm:$0xff]  }
  0x4c   : > { %v3040_v6 = vld [vmem:[%s4182_s1 + $0x4e4] ss:$16 sps:$4 sm:$0xff]   ;;  %v3732_v8 = vpack.c.bf16 %v308_v4, %v308_v4  ;;  %v3734_v9 = vpack.c.bf16 %v310_v5, %v310_v5  ;;  %v3038_v10 = vld [vmem:[%s4182_s1 + $0x4e0] ss:$16 sps:$4 sm:$0xff]   ;;  %v3121_v4 = vld [vmem:[%s4182_s1 + $0x16c] ss:$16 sps:$4 sm:$0xff]  }
  0x4d   : > { %1541 = vmatpush2.bf16.msra.mxu0 %v2994_v34  ;;  %v3043_v7 = vld [vmem:[%s4182_s1 + $0x604] ss:$16 sps:$4 sm:$0xff]   ;;  %v3041_v11 = vld [vmem:[%s4182_s1 + $0x600] ss:$16 sps:$4 sm:$0xff]  }
  0x4e   : > { %1582 = vmatpush2.bf16.msra.mxu1 %v2995_v35  ;;  %1542 = vmatprep.subr.bf16.mxu0 %v2996_v36  ;;  %v3046_v12 = vld [vmem:[%s4182_s1 + $0x4c4] ss:$16 sps:$4 sm:$0xff]   ;;  %v3044_v14 = vld [vmem:[%s4182_s1 + $0x4c0] ss:$16 sps:$4 sm:$0xff]   ;;  %v313_v35 = vld [vmem:[%s3654_s28 + $0x28] sm:$0xff] }
  0x4f   : > { %1583 = vmatprep.subr.bf16.mxu1 %v2998_v37  ;;  %v314_v15 = vld [vmem:[%s3654_s28 + $0x30] sm:$0xff]  ;;  %v3812_v36 = vpack.c.bf16 %v313_v35, %v313_v35  ;;  %v3071_v37 = vld [vmem:[%s4182_s1 + $0x68] ss:$16 sps:$4 sm:$0xff]  }
  0x50   : > { %v3052_v17 = vld [vmem:[%s4182_s1 + $0x4a4] ss:$16 sps:$4 sm:$0xff]   ;;  %v3761_v19 = vpack.c.bf16 %v314_v15, %v314_v15  ;;  %v3050_v20 = vld [vmem:[%s4182_s1 + $0x4a0] ss:$16 sps:$4 sm:$0xff]   ;;  %v3155_v35 = vld [vmem:[%s4182_s1 + $0x4a8] ss:$16 sps:$4 sm:$0xff]  }
  0x51   : > { %1543 = vmatpush2.bf16.msra.mxu0 %v3000_v38  ;;  %v3058_v22 = vld [vmem:[%s4182_s1 + $0x484] ss:$16 sps:$4 sm:$0xff]   ;;  %v3056_v24 = vld [vmem:[%s4182_s1 + $0x480] ss:$16 sps:$4 sm:$0xff]  }
  0x52   : > { %1584 = vmatpush2.bf16.msra.mxu1 %v3001_v39  ;;  %1544 = vmatprep.subr.bf16.mxu0 %v3002_v40  ;;  %v3064_v26 = vld [vmem:[%s4182_s1 + $0x464] ss:$16 sps:$4 sm:$0xff]   ;;  %v3062_v28 = vld [vmem:[%s4182_s1 + $0x460] ss:$16 sps:$4 sm:$0xff]   ;;  %v3079_v39 = vld [vmem:[%s4182_s1 + $0x4c] ss:$16 sps:$4 sm:$0xff]  }
  0x53   : > { %1585 = vmatprep.subr.bf16.mxu1 %v3004_v41  ;;  %v3070_v30 = vld [vmem:[%s4182_s1 + $0x444] ss:$16 sps:$4 sm:$0xff]   ;;  %v3068_v32 = vld [vmem:[%s4182_s1 + $0x440] ss:$16 sps:$4 sm:$0xff]   ;;  %v3077_v41 = vld [vmem:[%s4182_s1 + $0x48] ss:$16 sps:$4 sm:$0xff]  }
  0x54   : > { %v3076_v34 = vld [vmem:[%s4182_s1 + $0x424] ss:$16 sps:$4 sm:$0xff]   ;;  %v3074_v38 = vld [vmem:[%s4182_s1 + $0x420] ss:$16 sps:$4 sm:$0xff]  }
  0x55   : > { %1545 = vmatpush2.bf16.msra.mxu0 %v3006_v42  ;;  %v3082_v40 = vld [vmem:[%s4182_s1 + $0x404] ss:$16 sps:$4 sm:$0xff]   ;;  %v3080_v42 = vld [vmem:[%s4182_s1 + $0x400] ss:$16 sps:$4 sm:$0xff]  }
  0x56   : > { %1586 = vmatpush2.bf16.msra.mxu1 %v3007_v43  ;;  %1546 = vmatprep.subr.bf16.mxu0 %v3008_v44  ;;  %v3085_v43 = vld [vmem:[%s4182_s1 + $0x2c] ss:$16 sps:$4 sm:$0xff]   ;;  %v3088_v44 = vld [vmem:[%s4182_s1 + $0x5e4] ss:$16 sps:$4 sm:$0xff]   ;;  %v3086_v46 = vld [vmem:[%s4182_s1 + $0x5e0] ss:$16 sps:$4 sm:$0xff]  }
  0x57   : > { %1587 = vmatprep.subr.bf16.mxu1 %v3010_v45  ;;  %v3083_v45 = vld [vmem:[%s4182_s1 + $0x28] ss:$16 sps:$4 sm:$0xff]   ;;  %v3092_v50 = vld [vmem:[%s4182_s1 + $0x5c0] ss:$16 sps:$4 sm:$0xff]   ;;  %v3124_v5 = vld [vmem:[%s4182_s1 + $0x524] ss:$16 sps:$4 sm:$0xff]  }
  0x58   : > { %v312_v15 = vld [vmem:[%s3654_s28 + $0x20] sm:$0xff] }
  0x59   : > { %1547 = vmatpush2.bf16.msra.mxu0 %v3012_v47  ;;  %v3091_v47 = vld [vmem:[%s4182_s1 + $0xc] ss:$16 sps:$4 sm:$0xff]  }
  0x5a   : > { %1588 = vmatpush2.bf16.msra.mxu1 %v3013_v48  ;;  %1548 = vmatprep.subr.bf16.mxu0 %v3014_v51  ;;  %v3094_v48 = vld [vmem:[%s4182_s1 + $0x5c4] ss:$16 sps:$4 sm:$0xff]   ;;  %v3097_v51 = vld [vmem:[%s4182_s1 + $0x1ec] ss:$16 sps:$4 sm:$0xff]  }
  0x5b   : > { %1589 = vmatprep.subr.bf16.mxu1 %v3016_v53  ;;  %v3100_v53 = vld [vmem:[%s4182_s1 + $0x5a4] ss:$16 sps:$4 sm:$0xff]  }
  0x5d   : > { %1549 = vmatpush2.bf16.msra.mxu0 %v3018_v54  ;;  %v3095_v54 = vld [vmem:[%s4182_s1 + $0x1e8] ss:$16 sps:$4 sm:$0xff]  }
  0x5e   : > { %1590 = vmatpush2.bf16.msra.mxu1 %v3019_v55  ;;  %1550 = vmatprep.subr.bf16.mxu0 %v3020_v56  ;;  %v3098_v55 = vld [vmem:[%s4182_s1 + $0x5a0] ss:$16 sps:$4 sm:$0xff]   ;;  %v3103_v56 = vld [vmem:[%s4182_s1 + $0x1cc] ss:$16 sps:$4 sm:$0xff]  }
  0x5f   : > { %1591 = vmatprep.subr.bf16.mxu1 %v3022_v57  ;;  %v3106_v57 = vld [vmem:[%s4182_s1 + $0x584] ss:$16 sps:$4 sm:$0xff]  }
  0x61   : > { %1551 = vmatpush2.bf16.msra.mxu0 %v3024_v58  ;;  %v3101_v58 = vld [vmem:[%s4182_s1 + $0x1c8] ss:$16 sps:$4 sm:$0xff]  }
  0x62   : > { %1592 = vmatpush2.bf16.msra.mxu1 %v3025_v59  ;;  %1552 = vmatprep.subr.bf16.mxu0 %v3026_v60  ;;  %v3104_v59 = vld [vmem:[%s4182_s1 + $0x580] ss:$16 sps:$4 sm:$0xff]   ;;  %v3109_v60 = vld [vmem:[%s4182_s1 + $0x1ac] ss:$16 sps:$4 sm:$0xff]  }
  0x63   : > { %1593 = vmatprep.subr.bf16.mxu1 %v3028_v61  ;;  %v3112_v61 = vld [vmem:[%s4182_s1 + $0x564] ss:$16 sps:$4 sm:$0xff]  }
  0x65   : > { %1553 = vmatpush2.bf16.msra.mxu0 %v3030_v62  ;;  %v3107_v62 = vld [vmem:[%s4182_s1 + $0x1a8] ss:$16 sps:$4 sm:$0xff]  }
  0x66   : > { %1594 = vmatpush2.bf16.msra.mxu1 %v3031_v63  ;;  %1554 = vmatprep.subr.bf16.mxu0 %v3032_v0  ;;  %v3110_v63 = vld [vmem:[%s4182_s1 + $0x560] ss:$16 sps:$4 sm:$0xff]   ;;  %v3115_v0 = vld [vmem:[%s4182_s1 + $0x18c] ss:$16 sps:$4 sm:$0xff]  }
  0x67   : > { %1595 = vmatprep.subr.bf16.mxu1 %v3034_v1  ;;  %v3118_v1 = vld [vmem:[%s4182_s1 + $0x544] ss:$16 sps:$4 sm:$0xff]  }
  0x69   : > { %1555 = vmatpush2.bf16.msra.mxu0 %v3036_v2  ;;  %v3113_v2 = vld [vmem:[%s4182_s1 + $0x188] ss:$16 sps:$4 sm:$0xff]  }
  0x6a   : > { %1596 = vmatpush2.bf16.msra.mxu1 %v3037_v3  ;;  %1606 = vmatprep.subr.bf16.mxu0 %v3040_v6  ;;  %v3116_v3 = vld [vmem:[%s4182_s1 + $0x540] ss:$16 sps:$4 sm:$0xff]   ;;  %v3119_v6 = vld [vmem:[%s4182_s1 + $0x168] ss:$16 sps:$4 sm:$0xff]  }
  0x6b   : > { %1661 = vmatprep.subr.bf16.mxu1 %v3043_v7  ;;  %v3122_v7 = vld [vmem:[%s4182_s1 + $0x520] ss:$16 sps:$4 sm:$0xff]  }
  0x6c   : > { %1557 = vmatmul.mubr.bf16.vlgmr.msra.gmra.mxu0 %v3732_v8 }
  0x6d   : > { %1598 = vmatmul.mubr.bf16.vlgmr.msra.gmra.mxu1 %v3734_v9  ;;  %1607 = vmatpush1.bf16.msra.mxu0 %v3038_v10  ;;  %v3127_v10 = vld [vmem:[%s4182_s1 + $0x14c] ss:$16 sps:$4 sm:$0xff]  }
  0x6e   : > { %1662 = vmatpush1.bf16.msra.mxu1 %v3041_v11  ;;  %1608 = vmatprep.subr.bf16.mxu0 %v3046_v12  ;;  %v3130_v11 = vld [vmem:[%s4182_s1 + $0x504] ss:$16 sps:$4 sm:$0xff]   ;;  %v3125_v12 = vld [vmem:[%s4182_s1 + $0x148] ss:$16 sps:$4 sm:$0xff]  }
  0x6f   : > { %1679 = vmatprep.mubr.bf16.mxu1 %v3422_v16  ;;  %1688 = vmatprep.subr.bf16.mxu1 %v3049_v13  ;;  %v3128_v13 = vld [vmem:[%s4182_s1 + $0x500] ss:$16 sps:$4 sm:$0xff]  }
  0x70   : > { %1638 = vmatprep.mubr.bf16.mxu0 %v3812_v36 }
  0x71   : > { %1609 = vmatpush1.bf16.msra.mxu0 %v3044_v14  ;;  %v3133_v14 = vld [vmem:[%s4182_s1 + $0x12c] ss:$16 sps:$4 sm:$0xff]  }
  0x72   : > { %1610 = vmatprep.subr.bf16.mxu0 %v3052_v17  ;;  %v3136_v17 = vld [vmem:[%s4182_s1 + $0x2ec] ss:$16 sps:$4 sm:$0xff]  }
  0x75   : > { %2800 = vmatmul.mubr.msk.bf16.vlgmr.msra.gmra.mxu1 %vm1520_vm0, %v3761_v19  ;;  %1611 = vmatpush1.bf16.msra.mxu0 %v3050_v20  ;;  %v3939_v20 = vpack.c.bf16 %v312_v15, %v312_v15  ;;  %v3223_v15 = vld [vmem:[%s4182_s1 + $0x54c] ss:$16 sps:$4 sm:$0xff]  }
  0x76   : > { %1689 = vmatpush1.bf16.msra.mxu1 %v3047_v18  ;;  %1612 = vmatprep.subr.bf16.mxu0 %v3058_v22  ;;  %v3131_v18 = vld [vmem:[%s4182_s1 + $0x128] ss:$16 sps:$4 sm:$0xff]   ;;  %v3139_v22 = vld [vmem:[%s4182_s1 + $0x10c] ss:$16 sps:$4 sm:$0xff]  }
  0x77   : > { %1690 = vmatprep.subr.bf16.mxu1 %v3055_v21  ;;  %1720 = vmatprep.mubr.bf16.mxu1 %v3669_v49  ;;  %v3089_v49 = vld [vmem:[%s4182_s1 + $0x8] ss:$16 sps:$4 sm:$0xff]  }
  0x78   : > { %v3134_v21 = vld [vmem:[%s4182_s1 + $0x2e8] ss:$16 sps:$4 sm:$0xff]  }
  0x79   : > { %1613 = vmatpush1.bf16.msra.mxu0 %v3056_v24  ;;  %v3137_v24 = vld [vmem:[%s4182_s1 + $0x108] ss:$16 sps:$4 sm:$0xff]  }
  0x7a   : > { %1691 = vmatpush1.bf16.msra.mxu1 %v3053_v23  ;;  %1614 = vmatprep.subr.bf16.mxu0 %v3064_v26  ;;  %v3142_v23 = vld [vmem:[%s4182_s1 + $0x2cc] ss:$16 sps:$4 sm:$0xff]  }
  0x7b   : > { %1692 = vmatprep.subr.bf16.mxu1 %v3061_v25  ;;  %v3140_v25 = vld [vmem:[%s4182_s1 + $0x2c8] ss:$16 sps:$4 sm:$0xff]   ;;  %v3145_v26 = vld [vmem:[%s4182_s1 + $0x4ec] ss:$16 sps:$4 sm:$0xff]  }
  0x7d   : > { %1615 = vmatpush1.bf16.msra.mxu0 %v3062_v28  ;;  %v3143_v28 = vld [vmem:[%s4182_s1 + $0x4e8] ss:$16 sps:$4 sm:$0xff]  }
  0x7e   : > { %1693 = vmatpush1.bf16.msra.mxu1 %v3059_v27  ;;  %1616 = vmatprep.subr.bf16.mxu0 %v3070_v30  ;;  %v3148_v27 = vld [vmem:[%s4182_s1 + $0x2ac] ss:$16 sps:$4 sm:$0xff]  }
  0x7f   : > { %1694 = vmatprep.subr.bf16.mxu1 %v3067_v29  ;;  %v3146_v29 = vld [vmem:[%s4182_s1 + $0x2a8] ss:$16 sps:$4 sm:$0xff]   ;;  %v3151_v30 = vld [vmem:[%s4182_s1 + $0x4cc] ss:$16 sps:$4 sm:$0xff]  }
  0x81   : > { %1617 = vmatpush1.bf16.msra.mxu0 %v3068_v32  ;;  %v3149_v32 = vld [vmem:[%s4182_s1 + $0x4c8] ss:$16 sps:$4 sm:$0xff]  }
  0x82   : > { %1695 = vmatpush1.bf16.msra.mxu1 %v3065_v31  ;;  %1618 = vmatprep.subr.bf16.mxu0 %v3076_v34  ;;  %v3154_v31 = vld [vmem:[%s4182_s1 + $0x28c] ss:$16 sps:$4 sm:$0xff]  }
  0x83   : > { %1696 = vmatprep.subr.bf16.mxu1 %v3073_v33  ;;  %v3157_v33 = vld [vmem:[%s4182_s1 + $0x4ac] ss:$16 sps:$4 sm:$0xff]  }
  0x84   : > { %v3160_v34 = vld [vmem:[%s4182_s1 + $0x26c] ss:$16 sps:$4 sm:$0xff]  }
  0x85   : > { %1619 = vmatpush1.bf16.msra.mxu0 %v3074_v38  ;;  %v3166_v38 = vld [vmem:[%s4182_s1 + $0x24c] ss:$16 sps:$4 sm:$0xff]  }
  0x86   : > { %1697 = vmatpush1.bf16.msra.mxu1 %v3071_v37  ;;  %1620 = vmatprep.subr.bf16.mxu0 %v3082_v40  ;;  %v3163_v37 = vld [vmem:[%s4182_s1 + $0x48c] ss:$16 sps:$4 sm:$0xff]  }
  0x87   : > { %1698 = vmatprep.subr.bf16.mxu1 %v3079_v39  ;;  %v3164_v39 = vld [vmem:[%s4182_s1 + $0x248] ss:$16 sps:$4 sm:$0xff]   ;;  %v3169_v40 = vld [vmem:[%s4182_s1 + $0x46c] ss:$16 sps:$4 sm:$0xff]  }
  0x89   : > { %1621 = vmatpush1.bf16.msra.mxu0 %v3080_v42  ;;  %v3167_v42 = vld [vmem:[%s4182_s1 + $0x468] ss:$16 sps:$4 sm:$0xff]  }
  0x8a   : > { %1699 = vmatpush1.bf16.msra.mxu1 %v3077_v41  ;;  %1622 = vmatprep.subr.bf16.mxu0 %v3088_v44  ;;  %v3172_v41 = vld [vmem:[%s4182_s1 + $0x22c] ss:$16 sps:$4 sm:$0xff]  }
  0x8b   : > { %1700 = vmatprep.subr.bf16.mxu1 %v3085_v43  ;;  %v3170_v43 = vld [vmem:[%s4182_s1 + $0x228] ss:$16 sps:$4 sm:$0xff]   ;;  %v3175_v44 = vld [vmem:[%s4182_s1 + $0x44c] ss:$16 sps:$4 sm:$0xff]  }
  0x8d   : > { %1623 = vmatpush2.bf16.msra.mxu0 %v3086_v46  ;;  %v3173_v46 = vld [vmem:[%s4182_s1 + $0x448] ss:$16 sps:$4 sm:$0xff]  }
  0x8e   : > { %1701 = vmatpush1.bf16.msra.mxu1 %v3083_v45  ;;  %1624 = vmatprep.subr.bf16.mxu0 %v3094_v48  ;;  %v3178_v45 = vld [vmem:[%s4182_s1 + $0x20c] ss:$16 sps:$4 sm:$0xff]  }
  0x8f   : > { %1702 = vmatprep.subr.bf16.mxu1 %v3091_v47  ;;  %v3176_v47 = vld [vmem:[%s4182_s1 + $0x208] ss:$16 sps:$4 sm:$0xff]   ;;  %v3181_v48 = vld [vmem:[%s4182_s1 + $0x42c] ss:$16 sps:$4 sm:$0xff]  }
  0x91   : > { %1625 = vmatpush2.bf16.msra.mxu0 %v3092_v50  ;;  %v3179_v50 = vld [vmem:[%s4182_s1 + $0x428] ss:$16 sps:$4 sm:$0xff]  }
  0x92   : > { %1703 = vmatpush1.bf16.msra.mxu1 %v3089_v49  ;;  %1626 = vmatprep.subr.bf16.mxu0 %v3100_v53  ;;  %v3184_v49 = vld [vmem:[%s4182_s1 + $0x3ec] ss:$16 sps:$4 sm:$0xff]  }
  0x93   : > { %1704 = vmatprep.subr.bf16.mxu1 %v3097_v51  ;;  %v3182_v51 = vld [vmem:[%s4182_s1 + $0x3e8] ss:$16 sps:$4 sm:$0xff]   ;;  %v3187_v53 = vld [vmem:[%s4182_s1 + $0x40c] ss:$16 sps:$4 sm:$0xff]  }
  0x95   : > { %1627 = vmatpush2.bf16.msra.mxu0 %v3098_v55  ;;  %v3185_v55 = vld [vmem:[%s4182_s1 + $0x408] ss:$16 sps:$4 sm:$0xff]  }
  0x96   : > { %1705 = vmatpush2.bf16.msra.mxu1 %v3095_v54  ;;  %1628 = vmatprep.subr.bf16.mxu0 %v3106_v57  ;;  %v3190_v54 = vld [vmem:[%s4182_s1 + $0x3cc] ss:$16 sps:$4 sm:$0xff]  }
  0x97   : > { %1706 = vmatprep.subr.bf16.mxu1 %v3103_v56  ;;  %v3188_v56 = vld [vmem:[%s4182_s1 + $0x3c8] ss:$16 sps:$4 sm:$0xff]   ;;  %v3193_v57 = vld [vmem:[%s4182_s1 + $0x5ec] ss:$16 sps:$4 sm:$0xff]  }
  0x99   : > { %1629 = vmatpush2.bf16.msra.mxu0 %v3104_v59  ;;  %v3191_v59 = vld [vmem:[%s4182_s1 + $0x5e8] ss:$16 sps:$4 sm:$0xff]  }
  0x9a   : > { %1707 = vmatpush2.bf16.msra.mxu1 %v3101_v58  ;;  %1630 = vmatprep.subr.bf16.mxu0 %v3112_v61  ;;  %v3196_v58 = vld [vmem:[%s4182_s1 + $0x3ac] ss:$16 sps:$4 sm:$0xff]  }
  0x9b   : > { %1708 = vmatprep.subr.bf16.mxu1 %v3109_v60  ;;  %v3194_v60 = vld [vmem:[%s4182_s1 + $0x3a8] ss:$16 sps:$4 sm:$0xff]   ;;  %v3199_v61 = vld [vmem:[%s4182_s1 + $0x5cc] ss:$16 sps:$4 sm:$0xff]  }
  0x9d   : > { %1631 = vmatpush2.bf16.msra.mxu0 %v3110_v63  ;;  %v3197_v63 = vld [vmem:[%s4182_s1 + $0x5c8] ss:$16 sps:$4 sm:$0xff]  }
  0x9e   : > { %1709 = vmatpush2.bf16.msra.mxu1 %v3107_v62  ;;  %1632 = vmatprep.subr.bf16.mxu0 %v3118_v1  ;;  %v3202_v62 = vld [vmem:[%s4182_s1 + $0x38c] ss:$16 sps:$4 sm:$0xff]  }
  0x9f   : > { %1710 = vmatprep.subr.bf16.mxu1 %v3115_v0  ;;  %v3200_v0 = vld [vmem:[%s4182_s1 + $0x388] ss:$16 sps:$4 sm:$0xff]   ;;  %v3205_v1 = vld [vmem:[%s4182_s1 + $0x5ac] ss:$16 sps:$4 sm:$0xff]  }
  0xa1   : > { %1633 = vmatpush2.bf16.msra.mxu0 %v3116_v3  ;;  %v3203_v3 = vld [vmem:[%s4182_s1 + $0x5a8] ss:$16 sps:$4 sm:$0xff]  }
  0xa2   : > { %1711 = vmatpush2.bf16.msra.mxu1 %v3113_v2  ;;  %1634 = vmatprep.subr.bf16.mxu0 %v3124_v5  ;;  %v3208_v2 = vld [vmem:[%s4182_s1 + $0x36c] ss:$16 sps:$4 sm:$0xff]  }
  0xa3   : > { %1712 = vmatprep.subr.bf16.mxu1 %v3121_v4  ;;  %v3206_v4 = vld [vmem:[%s4182_s1 + $0x368] ss:$16 sps:$4 sm:$0xff]   ;;  %v3211_v5 = vld [vmem:[%s4182_s1 + $0x58c] ss:$16 sps:$4 sm:$0xff]  }
  0xa5   : > { %1635 = vmatpush2.bf16.msra.mxu0 %v3122_v7  ;;  %v3209_v7 = vld [vmem:[%s4182_s1 + $0x588] ss:$16 sps:$4 sm:$0xff]  }
  0xa6   : > { %1713 = vmatpush2.bf16.msra.mxu1 %v3119_v6  ;;  %1636 = vmatprep.subr.bf16.mxu0 %v3130_v11  ;;  %v3214_v6 = vld [vmem:[%s4182_s1 + $0x34c] ss:$16 sps:$4 sm:$0xff]  }
  0xa7   : > { %1714 = vmatprep.subr.bf16.mxu1 %v3127_v10  ;;  %v3212_v10 = vld [vmem:[%s4182_s1 + $0x348] ss:$16 sps:$4 sm:$0xff]   ;;  %v3217_v11 = vld [vmem:[%s4182_s1 + $0x56c] ss:$16 sps:$4 sm:$0xff]  }
  0xa9   : > { %1637 = vmatpush2.bf16.msra.mxu0 %v3128_v13  ;;  %v3215_v13 = vld [vmem:[%s4182_s1 + $0x568] ss:$16 sps:$4 sm:$0xff]  }
  0xaa   : > { %1715 = vmatpush2.bf16.msra.mxu1 %v3125_v12  ;;  %1729 = vmatprep.subr.bf16.mxu0 %v3136_v17  ;;  %v3220_v12 = vld [vmem:[%s4182_s1 + $0x32c] ss:$16 sps:$4 sm:$0xff]  }
  0xab   : > { %1716 = vmatprep.subr.bf16.mxu1 %v3133_v14  ;;  %v3218_v14 = vld [vmem:[%s4182_s1 + $0x328] ss:$16 sps:$4 sm:$0xff]   ;;  %v3226_v17 = vld [vmem:[%s4182_s1 + $0x30c] ss:$16 sps:$4 sm:$0xff]  }
  0xac   : > { %1639 = vmatmul.mubr.bf16.vlgmr.msra.gmra.mxu0 %v3939_v20 }
  0xad   : > { %1730 = vmatpush1.bf16.msra.mxu0 %v3134_v21  ;;  %1761 = vmatprep.mubr.bf16.mxu0 %v3675_v52  ;;  %v3152_v52 = vld [vmem:[%s4182_s1 + $0x288] ss:$16 sps:$4 sm:$0xff]  }
  0xae   : > { %1717 = vmatpush2.bf16.msra.mxu1 %v3131_v18  ;;  %1731 = vmatprep.subr.bf16.mxu0 %v3142_v23  ;;  %v3221_v18 = vld [vmem:[%s4182_s1 + $0x548] ss:$16 sps:$4 sm:$0xff]   ;;  %v3238_v23 = vld [vmem:[#allocation2 + $0x74] ss:$8 sps:$4 sm:$0xff]  }
  0xaf   : > { %1718 = vmatprep.subr.bf16.mxu1 %v3139_v22  ;;  %v3224_v21 = vld [vmem:[%s4182_s1 + $0x308] ss:$16 sps:$4 sm:$0xff]   ;;  %v3229_v22 = vld [vmem:[%s4182_s1 + $0x52c] ss:$16 sps:$4 sm:$0xff]  }
  0xb1   : > { %1732 = vmatpush1.bf16.msra.mxu0 %v3140_v25  ;;  %v3236_v25 = vld [vmem:[#allocation2 + $0x70] ss:$8 sps:$4 sm:$0xff]  }
  0xb2   : > { %1719 = vmatpush2.bf16.msra.mxu1 %v3137_v24  ;;  %1733 = vmatprep.subr.bf16.mxu0 %v3148_v27  ;;  %v3227_v24 = vld [vmem:[%s4182_s1 + $0x528] ss:$16 sps:$4 sm:$0xff]   ;;  %v3241_v27 = vld [vmem:[#allocation2 + $0x64] ss:$8 sps:$4 sm:$0xff]  }
  0xb3   : > { %1770 = vmatprep.subr.bf16.mxu1 %v3145_v26  ;;  %v3232_v26 = vld [vmem:[%s4182_s1 + $0x50c] ss:$16 sps:$4 sm:$0xff]  }
  0xb5   : > { %1721 = vmatmul.mubr.bf16.vlgmr.msra.gmra.mxu1 %v3732_v8  ;;  %1734 = vmatpush1.bf16.msra.mxu0 %v3146_v29  ;;  %v3158_v8 = vld [vmem:[%s4182_s1 + $0x268] ss:$16 sps:$4 sm:$0xff]  }
  0xb6   : > { %1771 = vmatpush1.bf16.msra.mxu1 %v3143_v28  ;;  %1735 = vmatprep.subr.bf16.mxu0 %v3154_v31  ;;  %v3230_v28 = vld [vmem:[%s4182_s1 + $0x508] ss:$16 sps:$4 sm:$0xff]   ;;  %v3244_v31 = vld [vmem:[#allocation2 + $0x54] ss:$8 sps:$4 sm:$0xff]  }
  0xb7   : > { %1772 = vmatprep.subr.bf16.mxu1 %v3151_v30  ;;  %1802 = vmatprep.mubr.bf16.mxu1 %v3812_v36  ;;  %v3161_v36 = vld [vmem:[%s4182_s1 + $0x488] ss:$16 sps:$4 sm:$0xff]   ;;  %v3235_v30 = vld [vmem:[%s4182_s1 + $0x60c] ss:$16 sps:$4 sm:$0xff]  }
  0xb8   : > { %v3239_v29 = vld [vmem:[#allocation2 + $0x60] ss:$8 sps:$4 sm:$0xff]  }
  0xb9   : > { %1736 = vmatpush1.bf16.msra.mxu0 %v3152_v52  ;;  %v3247_v52 = vld [vmem:[#allocation2 + $0x44] ss:$8 sps:$4 sm:$0xff]  }
  0xba   : > { %1773 = vmatpush1.bf16.msra.mxu1 %v3149_v32  ;;  %1737 = vmatprep.subr.bf16.mxu0 %v3160_v34  ;;  %v3233_v32 = vld [vmem:[%s4182_s1 + $0x608] ss:$16 sps:$4 sm:$0xff]   ;;  %v3250_v34 = vld [vmem:[#allocation2 + $0x34] ss:$8 sps:$4 sm:$0xff]  }
  0xbb   : > { %1774 = vmatprep.subr.bf16.mxu1 %v3157_v33  ;;  %v3245_v33 = vld [vmem:[#allocation2 + $0x40] ss:$8 sps:$4 sm:$0xff]  }
  0xbd   : > { %1738 = vmatpush1.bf16.msra.mxu0 %v3158_v8  ;;  %v3284_v8 = vld [vmem:[#allocation2 + $0x170] ss:$8 sps:$4 sm:$0xff]  }
  0xbe   : > { %1775 = vmatpush1.bf16.msra.mxu1 %v3155_v35  ;;  %1739 = vmatprep.subr.bf16.mxu0 %v3166_v38  ;;  %v3248_v35 = vld [vmem:[#allocation2 + $0x30] ss:$8 sps:$4 sm:$0xff]   ;;  %v3253_v38 = vld [vmem:[#allocation2 + $0x24] ss:$8 sps:$4 sm:$0xff]  }
  0xbf   : > { %1776 = vmatprep.subr.bf16.mxu1 %v3163_v37  ;;  %v3286_v37 = vld [vmem:[#allocation2 + $0x174] ss:$8 sps:$4 sm:$0xff]  }
  0xc1   : > { %1740 = vmatpush1.bf16.msra.mxu0 %v3164_v39  ;;  %v3251_v39 = vld [vmem:[#allocation2 + $0x20] ss:$8 sps:$4 sm:$0xff]  }
  0xc2   : > { %1777 = vmatpush1.bf16.msra.mxu1 %v3161_v36  ;;  %1741 = vmatprep.subr.bf16.mxu0 %v3172_v41  ;;  %v3289_v36 = vld [vmem:[#allocation2 + $0x164] ss:$8 sps:$4 sm:$0xff]   ;;  %v3290_v41 = vld [vmem:[#allocation2 + $0x150] ss:$8 sps:$4 sm:$0xff]  }
  0xc3   : > { %1778 = vmatprep.subr.bf16.mxu1 %v3169_v40  ;;  %v3256_v40 = vld [vmem:[#allocation2 + $0x14] ss:$8 sps:$4 sm:$0xff]  }
  0xc5   : > { %1742 = vmatpush1.bf16.msra.mxu0 %v3170_v43  ;;  %v3295_v43 = vld [vmem:[#allocation2 + $0x144] ss:$8 sps:$4 sm:$0xff]  }
  0xc6   : > { %1779 = vmatpush1.bf16.msra.mxu1 %v3167_v42  ;;  %1743 = vmatprep.subr.bf16.mxu0 %v3178_v45  ;;  %v3254_v42 = vld [vmem:[#allocation2 + $0x10] ss:$8 sps:$4 sm:$0xff]   ;;  %v3293_v45 = vld [vmem:[#allocation2 + $0x140] ss:$8 sps:$4 sm:$0xff]  }
  0xc7   : > { %1780 = vmatprep.subr.bf16.mxu1 %v3175_v44  ;;  %v3259_v44 = vld [vmem:[#allocation2 + $0x4] ss:$8 sps:$4 sm:$0xff]  }
  0xc9   : > { %1744 = vmatpush1.bf16.msra.mxu0 %v3176_v47  ;;  %v3262_v47 = vld [vmem:[#allocation2 + $0xf4] ss:$8 sps:$4 sm:$0xff]  }
  0xca   : > { %1781 = vmatpush1.bf16.msra.mxu1 %v3173_v46  ;;  %1745 = vmatprep.subr.bf16.mxu0 %v3184_v49  ;;  %v3298_v46 = vld [vmem:[#allocation2 + $0x134] ss:$8 sps:$4 sm:$0xff]   ;;  %v3260_v49 = vld [vmem:[#allocation2 + $0xf0] ss:$8 sps:$4 sm:$0xff]  }
  0xcb   : > { %1782 = vmatprep.subr.bf16.mxu1 %v3181_v48  ;;  %v3296_v48 = vld [vmem:[#allocation2 + $0x130] ss:$8 sps:$4 sm:$0xff]  }
  0xcd   : > { %1746 = vmatpush2.bf16.msra.mxu0 %v3182_v51  ;;  %v3265_v51 = vld [vmem:[#allocation2 + $0xe4] ss:$8 sps:$4 sm:$0xff]  }
  0xce   : > { %1783 = vmatpush1.bf16.msra.mxu1 %v3179_v50  ;;  %1747 = vmatprep.subr.bf16.mxu0 %v3190_v54  ;;  %v3301_v50 = vld [vmem:[#allocation2 + $0x124] ss:$8 sps:$4 sm:$0xff]   ;;  %v3263_v54 = vld [vmem:[#allocation2 + $0xe0] ss:$8 sps:$4 sm:$0xff]  }
  0xcf   : > { %1784 = vmatprep.subr.bf16.mxu1 %v3187_v53  ;;  %v3299_v53 = vld [vmem:[#allocation2 + $0x120] ss:$8 sps:$4 sm:$0xff]  }
  0xd1   : > { %1748 = vmatpush2.bf16.msra.mxu0 %v3188_v56  ;;  %v3268_v56 = vld [vmem:[#allocation2 + $0xd4] ss:$8 sps:$4 sm:$0xff]  }
  0xd2   : > { %1785 = vmatpush1.bf16.msra.mxu1 %v3185_v55  ;;  %1749 = vmatprep.subr.bf16.mxu0 %v3196_v58  ;;  %v3304_v55 = vld [vmem:[#allocation2 + $0x114] ss:$8 sps:$4 sm:$0xff]   ;;  %v3266_v58 = vld [vmem:[#allocation2 + $0xd0] ss:$8 sps:$4 sm:$0xff]  }
  0xd3   : > { %1786 = vmatprep.subr.bf16.mxu1 %v3193_v57  ;;  %v3302_v57 = vld [vmem:[#allocation2 + $0x110] ss:$8 sps:$4 sm:$0xff]  }
  0xd5   : > { %1750 = vmatpush2.bf16.msra.mxu0 %v3194_v60  ;;  %v3271_v60 = vld [vmem:[#allocation2 + $0xc4] ss:$8 sps:$4 sm:$0xff]  }
  0xd6   : > { %1787 = vmatpush2.bf16.msra.mxu1 %v3191_v59  ;;  %1751 = vmatprep.subr.bf16.mxu0 %v3202_v62  ;;  %v3307_v59 = vld [vmem:[#allocation2 + $0x104] ss:$8 sps:$4 sm:$0xff]   ;;  %v3269_v62 = vld [vmem:[#allocation2 + $0xc0] ss:$8 sps:$4 sm:$0xff]  }
  0xd7   : > { %1788 = vmatprep.subr.bf16.mxu1 %v3199_v61  ;;  %v3305_v61 = vld [vmem:[#allocation2 + $0x100] ss:$8 sps:$4 sm:$0xff]  }
  0xd9   : > { %1752 = vmatpush2.bf16.msra.mxu0 %v3200_v0  ;;  %v3274_v0 = vld [vmem:[#allocation2 + $0xb4] ss:$8 sps:$4 sm:$0xff]  }
  0xda   : > { %1789 = vmatpush2.bf16.msra.mxu1 %v3197_v63  ;;  %1753 = vmatprep.subr.bf16.mxu0 %v3208_v2  ;;  %v3310_v63 = vld [vmem:[#allocation2 + $0x1f4] ss:$8 sps:$4 sm:$0xff]   ;;  %v3272_v2 = vld [vmem:[#allocation2 + $0xb0] ss:$8 sps:$4 sm:$0xff]  }
  0xdb   : > { %1790 = vmatprep.subr.bf16.mxu1 %v3205_v1  ;;  %v3308_v1 = vld [vmem:[#allocation2 + $0x1f0] ss:$8 sps:$4 sm:$0xff]  }
  0xdd   : > { %1754 = vmatpush2.bf16.msra.mxu0 %v3206_v4  ;;  %v3277_v4 = vld [vmem:[#allocation2 + $0xa4] ss:$8 sps:$4 sm:$0xff]  }
  0xde   : > { %1791 = vmatpush2.bf16.msra.mxu1 %v3203_v3  ;;  %1755 = vmatprep.subr.bf16.mxu0 %v3214_v6  ;;  %v3313_v3 = vld [vmem:[#allocation2 + $0x1e4] ss:$8 sps:$4 sm:$0xff]   ;;  %v3275_v6 = vld [vmem:[#allocation2 + $0xa0] ss:$8 sps:$4 sm:$0xff]  }
  0xdf   : > { %1792 = vmatprep.subr.bf16.mxu1 %v3211_v5  ;;  %v3311_v5 = vld [vmem:[#allocation2 + $0x1e0] ss:$8 sps:$4 sm:$0xff]  }
  0xe1   : > { %1756 = vmatpush2.bf16.msra.mxu0 %v3212_v10  ;;  %v3278_v10 = vld [vmem:[#allocation2 + $0x90] ss:$8 sps:$4 sm:$0xff]  }
  0xe2   : > { %1793 = vmatpush2.bf16.msra.mxu1 %v3209_v7  ;;  %1757 = vmatprep.subr.bf16.mxu0 %v3220_v12  ;;  %v3280_v7 = vld [vmem:[#allocation2 + $0x94] ss:$8 sps:$4 sm:$0xff]   ;;  %v3281_v12 = vld [vmem:[#allocation2 + $0x80] ss:$8 sps:$4 sm:$0xff]  }
  0xe3   : > { %1794 = vmatprep.subr.bf16.mxu1 %v3217_v11  ;;  %v3283_v11 = vld [vmem:[#allocation2 + $0x84] ss:$8 sps:$4 sm:$0xff]  }
  0xe5   : > { %1758 = vmatpush2.bf16.msra.mxu0 %v3218_v14 }
  0xe6   : > { %1795 = vmatpush2.bf16.msra.mxu1 %v3215_v13  ;;  %1759 = vmatprep.subr.bf16.mxu0 %v3226_v17  ;;  %v3314_v17 = vld [vmem:[#allocation2 + $0x1d0] ss:$8 sps:$4 sm:$0xff]  }
  0xe7   : > { %1796 = vmatprep.subr.bf16.mxu1 %v3223_v15  ;;  %v3316_v15 = vld [vmem:[#allocation2 + $0x1d4] ss:$8 sps:$4 sm:$0xff]  }
  0xe9   : > { %1760 = vmatpush2.bf16.msra.mxu0 %v3224_v21 }
  0xea   : > { %1797 = vmatpush2.bf16.msra.mxu1 %v3221_v18  ;;  %2256 = vmatprep.subr.bf16.mxu0 %v3238_v23  ;;  %v3319_v23 = vld [vmem:[#allocation2 + $0x1c4] ss:$8 sps:$4 sm:$0xff]  }
  0xeb   : > { %1798 = vmatprep.subr.bf16.mxu1 %v3229_v22  ;;  %v3317_v22 = vld [vmem:[#allocation2 + $0x1c0] ss:$8 sps:$4 sm:$0xff]  }
  0xec   : > { %1762 = vmatmul.mubr.bf16.vlgmr.msra.gmra.mxu0 %v3734_v9  ;;  %v3242_v9 = vld [vmem:[#allocation2 + $0x50] ss:$8 sps:$4 sm:$0xff]  }
  0xed   : > { %2257 = vmatpush1.bf16.msra.mxu0 %v3236_v25 }
  0xee   : > { %1799 = vmatpush2.bf16.msra.mxu1 %v3227_v24  ;;  %2258 = vmatprep.subr.bf16.mxu0 %v3241_v27 }
  0xef   : > { %1800 = vmatprep.subr.bf16.mxu1 %v3232_v26 }
  0xf1   : > { %2259 = vmatpush1.bf16.msra.mxu0 %v3239_v29  ;;  %v3322_v29 = vld [vmem:[#allocation2 + $0x1b4] ss:$8 sps:$4 sm:$0xff]  }
  0xf2   : > { %1801 = vmatpush2.bf16.msra.mxu1 %v3230_v28  ;;  %2260 = vmatprep.subr.bf16.mxu0 %v3244_v31 }
  0xf3   : > { %1825 = vmatprep.subr.bf16.mxu1 %v3235_v30  ;;  %v3320_v30 = vld [vmem:[#allocation2 + $0x1b0] ss:$8 sps:$4 sm:$0xff]  }
  0xf5   : > { %1803 = vmatmul.mubr.bf16.vlgmr.msra.gmra.mxu1 %v3939_v20  ;;  %2261 = vmatpush1.bf16.msra.mxu0 %v3242_v9  ;;  %v3287_v20 = vld [vmem:[#allocation2 + $0x160] ss:$8 sps:$4 sm:$0xff]   ;;  %v3325_v9 = vld [vmem:[#allocation2 + $0x1a4] ss:$8 sps:$4 sm:$0xff]  }
  0xf6   : > { %1826 = vmatpush1.bf16.msra.mxu1 %v3233_v32  ;;  %1843 = vmatprep.mubr.bf16.mxu1 %v3422_v16  ;;  %v3292_v16 = vld [vmem:[#allocation2 + $0x154] ss:$8 sps:$4 sm:$0xff]  }
  0xf7   : > { %2262 = vmatprep.subr.bf16.mxu0 %v3247_v52  ;;  %2297 = vmatprep.subr.bf16.mxu1 %v3286_v37  ;;  %v3323_v52 = vld [vmem:[#allocation2 + $0x1a0] ss:$8 sps:$4 sm:$0xff]  }
  0xf8   : > { %v3329_v37 = vld [vmem:[#allocation2 + $0x180] ss:$8 sps:$4 sm:$0xff]  }
  0xf9   : > { %2263 = vmatpush1.bf16.msra.mxu0 %v3245_v33 }
  0xfa   : > { %2264 = vmatprep.subr.bf16.mxu0 %v3250_v34  ;;  %v3328_v34 = vld [vmem:[#allocation2 + $0x194] ss:$8 sps:$4 sm:$0xff]  }
  0xfd   : > { %2801 = vmatmul.mubr.msk.bf16.vlgmr.msra.gmra.mxu1 %vm1520_vm0, %v3761_v19  ;;  %2265 = vmatpush1.bf16.msra.mxu0 %v3248_v35  ;;  %v3257_v19 = vld [vmem:[#allocation2] ss:$8 sps:$4 sm:$0xff]   ;;  %v3326_v35 = vld [vmem:[#allocation2 + $0x190] ss:$8 sps:$4 sm:$0xff]  }
  0xfe   : > { %2298 = vmatpush1.bf16.msra.mxu1 %v3284_v8  ;;  %2266 = vmatprep.subr.bf16.mxu0 %v3253_v38  ;;  %v3331_v8 = vld [vmem:[#allocation2 + $0x184] ss:$8 sps:$4 sm:$0xff]   ;;  %v520_v38 = vlaneseq }
  0xff   : > { %2299 = vmatprep.subr.bf16.mxu1 %v3289_v36 }
 0x100   : > { %v4151_v36 = vshrl.u32 %v520_v38, 7  ;;  %v3341_v38 = vld [vmem:[#allocation4 + $0x18] sm:$0xff]  }
 0x101   : > { %2267 = vmatpush1.bf16.msra.mxu0 %v3251_v39  ;;  %v518_v39 = vld [vmem:[%s4183_s2] sm:$0xf] }
 0x102   : > { %2300 = vmatpush1.bf16.msra.mxu1 %v3287_v20  ;;  %2268 = vmatprep.subr.bf16.mxu0 %v3256_v40  ;;  %v522_v20 = vsub.s32 0, %v4151_v36 }
 0x103   : > { %2301 = vmatprep.subr.bf16.mxu1 %v3292_v16  ;;  %v526_v16 = vsub.s32 1, %v4151_v36 }
 0x104   : > { %v523_v40 = vrot.slane %v518_v39, %v522_v20 }
 0x105   : > { %2269 = vmatpush1.bf16.msra.mxu0 %v3254_v42 }
 0x106   : > { %2302 = vmatpush1.bf16.msra.mxu1 %v3290_v41  ;;  %2270 = vmatprep.subr.bf16.mxu0 %v3259_v44  ;;  %v527_v41 = vrot.slane %v518_v39, %v526_v16 }
 0x107   : > { %2303 = vmatprep.subr.bf16.mxu1 %v3295_v43 }
 0x109   : > { %2271 = vmatpush1.bf16.msra.mxu0 %v3257_v19 }
 0x10a   : > { %2304 = vmatpush1.bf16.msra.mxu1 %v3293_v45  ;;  %2272 = vmatprep.subr.bf16.mxu0 %v3262_v47 }
 0x10b   : > { %2305 = vmatprep.subr.bf16.mxu1 %v3298_v46 }
 0x10d   : > { %2273 = vmatpush2.bf16.msra.mxu0 %v3260_v49 }
 0x10e   : > { %2306 = vmatpush1.bf16.msra.mxu1 %v3296_v48  ;;  %2274 = vmatprep.subr.bf16.mxu0 %v3265_v51 }
 0x10f   : > { %2307 = vmatprep.subr.bf16.mxu1 %v3301_v50 }
 0x111   : > { %2275 = vmatpush2.bf16.msra.mxu0 %v3263_v54 }
 0x112   : > { %2308 = vmatpush1.bf16.msra.mxu1 %v3299_v53  ;;  %2276 = vmatprep.subr.bf16.mxu0 %v3268_v56 }
 0x113   : > { %2309 = vmatprep.subr.bf16.mxu1 %v3304_v55 }
 0x115   : > { %2277 = vmatpush2.bf16.msra.mxu0 %v3266_v58 }
 0x116   : > { %2310 = vmatpush1.bf16.msra.mxu1 %v3302_v57  ;;  %2278 = vmatprep.subr.bf16.mxu0 %v3271_v60 }
 0x117   : > { %2311 = vmatprep.subr.bf16.mxu1 %v3307_v59 }
 0x119   : > { %2279 = vmatpush2.bf16.msra.mxu0 %v3269_v62 }
 0x11a   : > { %2312 = vmatpush1.bf16.msra.mxu1 %v3305_v61  ;;  %2280 = vmatprep.subr.bf16.mxu0 %v3274_v0  ;;  %v530_v0 = vsub.s32 2, %v4151_v36 }
 0x11b   : > { %2313 = vmatprep.subr.bf16.mxu1 %v3310_v63 }
 0x11d   : > { %2281 = vmatpush2.bf16.msra.mxu0 %v3272_v2  ;;  %v534_v2 = vsub.s32 3, %v4151_v36  ;;  %v2866_v36 = vld [vmem:[%s4187_s6] ss:$0 sm:$0xff] }
 0x11e   : > { %2314 = vmatpush2.bf16.msra.mxu1 %v3308_v1  ;;  %2282 = vmatprep.subr.bf16.mxu0 %v3277_v4  ;;  %v531_v4 = vrot.slane %v518_v39, %v530_v0 }
 0x11f   : > { %2315 = vmatprep.subr.bf16.mxu1 %v3313_v3 }
 0x121   : > { %2283 = vmatpush2.bf16.msra.mxu0 %v3275_v6  ;;  %v535_v6 = vrot.slane %v518_v39, %v534_v2  ;;  %v3342_v39 = vld [vmem:[#allocation4 + $0x50] sm:$0xff]  }
 0x122   : > { %2316 = vmatpush2.bf16.msra.mxu1 %v3311_v5  ;;  %2284 = vmatprep.subr.bf16.mxu0 %v3280_v7 }
 0x123   : > { %2317 = vmatprep.subr.bf16.mxu1 %v3316_v15 }
 0x125   : > { %2285 = vmatpush2.bf16.msra.mxu0 %v3278_v10 }
 0x126   : > { %2286 = vmatprep.subr.bf16.mxu0 %v3283_v11  ;;  %2318 = vmatpush2.bf16.msra.mxu1 %v3314_v17 }
 0x127   : > { %2319 = vmatprep.subr.bf16.mxu1 %v3319_v23 }
 0x129   : > { %2287 = vmatpush2.bf16.msra.mxu0 %v3281_v12 }
 0x12a   : > { %2320 = vmatpush2.bf16.msra.mxu1 %v3317_v22 }
 0x12b   : > { %2321 = vmatprep.subr.bf16.mxu1 %v3322_v29 }
 0x12c   : > { %v1558_v13 = vpop.f32.mrf.mxu0 }
 0x12d   : > { %v1599_v14 = vpop.f32.mrf.mxu1  ;;  %v1559_v42 = vadd.f32 %v1558_v13, %v523_v40  ;;  %v3343_v40 = vld [vmem:[#allocation4 + $0x10] sm:$0xff]  }
 0x12e   : > { %v1560_v18 = vpop.f32.mrf.mxu0  ;;  %2322 = vmatpush2.bf16.msra.mxu1 %v3320_v30 }
 0x12f   : > { %v1601_v21 = vpop.f32.mrf.mxu1  ;;  %2323 = vmatprep.subr.bf16.mxu1 %v3325_v9  ;;  %v1561_v43 = vadd.f32 %v1560_v18, %v527_v41  ;;  %v1600_v44 = vadd.f32 %v1599_v14, %v1559_v42  ;;  %v3336_v9 = vld [vmem:[#allocation4 + $0x68] sm:$0xff]  }
 0x130   : > { %v1562_v25 = vpop.f32.mrf.mxu0  ;;  %v3344_v41 = vld [vmem:[#allocation4 + $0x48] sm:$0xff]  }
 0x131   : > { %v1603_v24 = vpop.f32.mrf.mxu1  ;;  %v1602_v19 = vadd.f32 %v1601_v21, %v1561_v43  ;;  %v3333_v25 = vld [vmem:[#allocation4 + $0x38] sm:$0xff]   ;;  %v3345_v42 = vld [vmem:[#allocation4 + $0x8] sm:$0xff]   ;;  %v3346_v43 = vld [vmem:[#allocation4 + $0x40] sm:$0xff]  }
 0x132   : > { %v1563_v27 = vpop.f32.mrf.mxu0  ;;  %2324 = vmatpush2.bf16.msra.mxu1 %v3323_v52  ;;  %v3332_v24 = vld [vmem:[#allocation4 + $0x78] sm:$0xff]  }
 0x133   : > { %v1604_v26 = vpop.f32.mrf.mxu1  ;;  %2325 = vmatprep.subr.bf16.mxu1 %v3328_v34  ;;  %2885 = vmatprep.subr.bf16.mxu0 %v3332_v24  ;;  %v3337_v34 = vld [vmem:[#allocation4 + $0x28] sm:$0xff]  }
 0x134   : > { %v3334_v26 = vld [vmem:[#allocation4 + $0x70] sm:$0xff]  }
 0x135   : > { %v1681_v28 = vpop.f32.mrf.mxu1 }
 0x136   : > { %2326 = vmatpush2.bf16.msra.mxu1 %v3326_v35  ;;  %v3338_v35 = vld [vmem:[#allocation4 + $0x60] sm:$0xff]  }
 0x137   : > { %v1683_v31 = vpop.f32.mrf.mxu1  ;;  %2327 = vmatprep.subr.bf16.mxu1 %v3331_v8  ;;  %v3339_v8 = vld [vmem:[#allocation4 + $0x20] sm:$0xff]  }
 0x139   : > { %v1685_v32 = vpop.f32.mrf.mxu1 }
 0x13a   : > { %2328 = vmatpush2.bf16.msra.mxu1 %v3329_v37  ;;  %v3340_v37 = vld [vmem:[#allocation4 + $0x58] sm:$0xff]  }
 0x13b   : > { %v1686_v33 = vpop.f32.mrf.mxu1 }
 0x16c   : > { %v1640_v45 = vpop.f32.mrf.mxu0 }
 0x16d   : > { %v1641_v46 = vadd.f32 %v1640_v45, %v1600_v44  ;;  %v3347_v44 = vld [vmem:[#allocation4] sm:$0xff]  }
 0x16e   : > { %v1642_v47 = vpop.f32.mrf.mxu0 }
 0x16f   : > { %v1682_v48 = vadd.f32 %v1681_v28, %v1641_v46  ;;  %v1643_v49 = vadd.f32 %v1642_v47, %v1602_v19 }
 0x170   : > { %v1644_v50 = vpop.f32.mrf.mxu0 }
 0x171   : > { %v1684_v51 = vadd.f32 %v1683_v31, %v1643_v49  ;;  %v1852_v53 = vmax.f32 %v1682_v48, 0.0  ;;  %v3335_v31 = vld [vmem:[#allocation4 + $0x30] sm:$0xff]   ;;  %v1924_v48 = vld [vmem:[%s4185_s4] sm:$0x3] }
 0x172   : > { %v1645_v54 = vpop.f32.mrf.mxu0  ;;  %v1929_v49 = vrot.slane %v1924_v48, %v522_v20  ;;  %v1933_v50 = vrot.slane %v1924_v48, %v526_v16 }
 0x173   : > { %v1853_v55 = vmax.f32 %v1684_v51, 0.0  ;;  %v1856_v58 = vpack.c.bf16 %v1852_v53, %v1852_v53 }
 0x175   : > { %v1722_v56 = vpop.f32.mrf.mxu1  ;;  %v1857_v57 = vpack.c.bf16 %v1853_v55, %v1853_v55 }
 0x176   : > { %v1723_v10 = vadd.f32 %v1722_v56, %v531_v4 }
 0x177   : > { %v1724_v59 = vpop.f32.mrf.mxu1  ;;  %2288 = vmatprep.mubr.bf16.mxu0 %v1857_v57 }
 0x178   : > { %2289 = vmatmul.mubr.bf16.vlgmr.msra.gmra.mxu0 %v1856_v58  ;;  %v1725_v12 = vadd.f32 %v1724_v59, %v535_v6 }
 0x179   : > { %v1726_v60 = vpop.f32.mrf.mxu1  ;;  %2886 = vmatpush3.bf16.msra.mxu0 %v3333_v25 }
 0x17a   : > { %2887 = vmatprep.subr.bf16.mxu0 %v3334_v26 }
 0x17b   : > { %v1727_v61 = vpop.f32.mrf.mxu1 }
 0x17d   : > { %2888 = vmatpush3.bf16.msra.mxu0 %v3335_v31 }
 0x17e   : > { %2889 = vmatprep.subr.bf16.mxu0 %v3336_v9 }
 0x181   : > { %2890 = vmatpush3.bf16.msra.mxu0 %v3337_v34 }
 0x182   : > { %2891 = vmatprep.subr.bf16.mxu0 %v3338_v35 }
 0x185   : > { %2892 = vmatpush3.bf16.msra.mxu0 %v3339_v8 }
 0x186   : > { %2893 = vmatprep.subr.bf16.mxu0 %v3340_v37 }
 0x189   : > { %2894 = vmatpush3.bf16.msra.mxu0 %v3341_v38 }
 0x18a   : > { %2895 = vmatprep.subr.bf16.mxu0 %v3342_v39 }
 0x18d   : > { %2896 = vmatpush3.bf16.msra.mxu0 %v3343_v40 }
 0x18e   : > { %2897 = vmatprep.subr.bf16.mxu0 %v3344_v41 }
 0x191   : > { %2898 = vmatpush3.bf16.msra.mxu0 %v3345_v42 }
 0x192   : > { %2899 = vmatprep.subr.bf16.mxu0 %v3346_v43 }
 0x195   : > { %2900 = vmatpush3.bf16.msra.mxu0 %v3347_v44 }
 0x1ac   : > { %v1763_v62 = vpop.f32.mrf.mxu0 }
 0x1ad   : > { %v1764_v13 = vadd.f32 %v1763_v62, %v1723_v10 }
 0x1ae   : > { %v1765_v63 = vpop.f32.mrf.mxu0 }
 0x1af   : > { %v1766_v15 = vadd.f32 %v1765_v63, %v1725_v12 }
 0x1b0   : > { %v1767_v1 = vpop.f32.mrf.mxu0 }
 0x1b2   : > { %v1768_v3 = vpop.f32.mrf.mxu0 }
 0x1b5   : > { %v1804_v5 = vpop.f32.mrf.mxu1 }
 0x1b6   : > { %v1805_v17 = vadd.f32 %v1804_v5, %v1764_v13 }
 0x1b7   : > { %v1806_v7 = vpop.f32.mrf.mxu1 }
 0x1b8   : > { %v1807_v21 = vadd.f32 %v1806_v7, %v1766_v15 }
 0x1b9   : > { %v1808_v11 = vpop.f32.mrf.mxu1 }
 0x1bb   : > { %v1809_v14 = vpop.f32.mrf.mxu1 }
 0x1bd   : > { %v1845_v18 = vpop.f32.mrf.mxu1 }
 0x1be   : > { %v1846_v22 = vadd.f32 %v1845_v18, %v1805_v17 }
 0x1bf   : > { %v1847_v23 = vpop.f32.mrf.mxu1 }
 0x1c0   : > { %v1848_v27 = vadd.f32 %v1847_v23, %v1807_v21  ;;  %v1854_v28 = vmax.f32 %v1846_v22, 0.0 }
 0x1c1   : > { %v1849_v29 = vpop.f32.mrf.mxu1 }
 0x1c2   : > { %v1855_v30 = vmax.f32 %v1848_v27, 0.0  ;;  %v1858_v33 = vpack.c.bf16 %v1854_v28, %v1854_v28 }
 0x1c3   : > { %v1850_v32 = vpop.f32.mrf.mxu1 }
 0x1c4   : > { %v1859_v52 = vpack.c.bf16 %v1855_v30, %v1855_v30 }
 0x1c6   : > { %2329 = vmatprep.mubr.bf16.mxu1 %v1859_v52 }
 0x1c7   : > { %2330 = vmatmul.mubr.bf16.vlgmr.msra.gmra.mxu1 %v1858_v33 }
 0x238   : > { %v2290_v45 = vpop.f32.mrf.mxu0 }
 0x239   : > { %v2291_v51 = vadd.f32 %v2290_v45, %v1929_v49 }
 0x23a   : > { %v2292_v19 = vpop.f32.mrf.mxu0 }
 0x23b   : > { %v2293_v54 = vadd.f32 %v2292_v19, %v1933_v50 }
 0x23c   : > { %v2294_v46 = vpop.f32.mrf.mxu0 }
 0x23e   : > { %v2295_v47 = vpop.f32.mrf.mxu0 }
 0x287   : > { %v2331_v53 = vpop.f32.mrf.mxu1 }
 0x288   : > { %v2332_v55 = vadd.f32 %v2331_v53, %v2291_v51 }
 0x289   : > { %v2333_v56 = vpop.f32.mrf.mxu1 }
 0x28a   : > { %v2334_v57 = vadd.f32 %v2333_v56, %v2293_v54  ;;  %v2338_v58 = vmax.f32 %v2332_v55, 0.0 }
 0x28b   : > { %v2335_v59 = vpop.f32.mrf.mxu1 }
 0x28c   : > { %v2339_v60 = vmax.f32 %v2334_v57, 0.0  ;;  %v2340_v63 = vpack.c.bf16 %v2338_v58, %v2338_v58 }
 0x28d   : > { %v2336_v61 = vpop.f32.mrf.mxu1 }
 0x28e   : > { %v2341_v62 = vpack.c.bf16 %v2339_v60, %v2339_v60 }
 0x290   : > { %2509 = vmatprep.mubr.bf16.mxu0 %v2341_v62 }
 0x291   : > { %2510 = vmatmul.mubr.bf16.vlgmr.msra.gmra.mxu0 %v2340_v63 }
 0x351   : > { %v2901_v0 = vpop.f32.mrf.mxu0 }
 0x353   : > { %v2902_v20 = vpop.f32.mrf.mxu0 }
 0x354   : > { %v2903_v16 = vadd.f32 %v2902_v20, %v2901_v0 }
 0x355   : > { %v2904_v1 = vpop.f32.mrf.mxu0 }
 0x356   : > { %v2512_v2 = vadd.f32 %v2903_v16, %v2866_v36 }
 0x357   : > { %v2905_v3 = vpop.f32.mrf.mxu0 }
 0x358   : > { %2517 = vst [vmem:[%s306_s12] sm:$0xff] %v2512_v2 }
 0x359 PF: > { %s19_s24 = sadd.s32 1, %s3414_s24  }
 0x35a   : > { %p16_p3 = scmp.ge.s32.totalorder %s19_s24, 4  }
 0x35c   :  { %18 = sbr.rel (!%p16_p3) target bundleno = 2 (0x2), region = 87 }
 0x361   :  { %2537 = vsyncpa [#allocation3], 1 }
 0x362   :  { %2539 = vsyncpa [#allocation3 + $0x1], 1 }
 0x363   :  { %2540 = vsyncpa [#allocation5], 1 }

</bundles_post_ra>
